<compile_context>
chip_gen: v7x
topology: tpu7x:2x2x1
jax: 0.10.0
libtpu: 0.0.40
codegen_flags: <defaults>
</compile_context>

<pallas_src>
import jax
import jax.numpy as jnp
from jax.experimental import pallas as pl
from jax.experimental.pallas import tpu as pltpu

INPUT_SIZE = 1
HIDDEN_SIZE = 15
OUT_SIZE = 1

LANE = 128            # lane-dense last axis (full vreg width, unmasked stores)
SUBLANE = 8
MAX_BLOCK_ROWS = 512  # 512 x 128 f32 = 256 KiB per tile (review: keep unroll/vreg pressure down)


def _make_mlp_kernel(tanh_dtype):
    def mlp_kernel(params_ref, x_ref, o_ref):
        # params_ref: SMEM f32[3*H + 1] = [w1[0:H], b1[H:2H], w2[2H:3H], b2[3H]]
        # x_ref / o_ref: (block_rows, LANE) f32 -- batch spread over sublanes+lanes.
        #
        # Hoist all 46 scalar params into locals once, BEFORE touching x, so the
        # scalar->vreg splats are not rematerialized per 8x128 chunk (perf review).
        w1 = [params_ref[j] for j in range(HIDDEN_SIZE)]
        b1 = [params_ref[HIDDEN_SIZE + j] for j in range(HIDDEN_SIZE)]
        w2 = [params_ref[2 * HIDDEN_SIZE + j] for j in range(HIDDEN_SIZE)]
        b2 = params_ref[3 * HIDDEN_SIZE]

        x = x_ref[...]
        acc = jnp.zeros_like(x)
        # Static 15-way unroll: pure VPU fma + EUP tanh, no MXU (K=1 / out width 1
        # would leave the MXU <1% utilized).
        for j in range(HIDDEN_SIZE):
            pre = x * w1[j] + b1[j]                        # f32 fma (VPU)
            h = jnp.tanh(pre.astype(tanh_dtype))           # EUP tanh (bf16 = 2x on v6e/v7x)
            acc = acc + h.astype(jnp.float32) * w2[j]      # f32 accumulate (VPU)
        o_ref[...] = jnp.tanh(acc + b2)                    # final tanh kept in f32
    return mlp_kernel


def simple_nnet_forward(x, w1, b1, w2, b2, *, max_block_rows=MAX_BLOCK_ROWS,
                        tanh_dtype=jnp.float32):
    """Two-layer tanh MLP forward pass (batch of scalar inputs) via Pallas.

    x: (N, 1) float32 (any N; the wrapper pads/slices as needed).
    Weights stored pre-transposed: w1 (1, 15), b1 (1, 15), w2 (15, 1), b2 (1, 1).
    tanh_dtype: jnp.float32 (exact) or jnp.bfloat16 (fast path for v6e/v7x only).
    """
    n, in_f = x.shape
    assert in_f == INPUT_SIZE

    # Pack all parameters into one small SMEM-resident vector (46 floats).
    params = jnp.concatenate([
        w1.reshape(-1).astype(jnp.float32),
        b1.reshape(-1).astype(jnp.float32),
        w2.reshape(-1).astype(jnp.float32),
        b2.reshape(-1).astype(jnp.float32),
    ])

    # Lane-dense batch layout: (N,) -> (rows_padded, LANE).
    rows = -(-n // LANE)
    num_blocks = -(-rows // max_block_rows)
    # Give v7x's second TensorCore at least one grid step whenever the batch
    # allows a >= 2-way split with 8-sublane-aligned blocks.
    if rows >= 2 * SUBLANE:
        num_blocks = max(num_blocks, 2)
    per_block = -(-rows // num_blocks)
    block_rows = -(-per_block // SUBLANE) * SUBLANE       # sublane-align (multiple of 8)
    grid_n = -(-rows // block_rows)
    rows_padded = grid_n * block_rows
    n_padded = rows_padded * LANE

    xf = x.reshape(-1).astype(jnp.float32)
    if n_padded != n:
        # TODO(synk): for ragged batches this pad (and the matching slice below)
        # costs one extra non-overlapped HBM pass; an in-kernel tail mask via
        # pltpu.store(mask=...) would avoid it. Aligned batches skip it entirely.
        xf = jnp.pad(xf, (0, n_padded - n))
    x2d = xf.reshape(rows_padded, LANE)

    out2d = pl.pallas_call(
        _make_mlp_kernel(tanh_dtype),
        out_shape=jax.ShapeDtypeStruct((rows_padded, LANE), jnp.float32),
        grid_spec=pl.GridSpec(
            grid=(grid_n,),
            in_specs=[
                # All 46 params live in SMEM, resident across every grid step
                # (single tiny transfer; no per-step DMA channel).
                pl.BlockSpec(memory_space=pltpu.MemorySpace.SMEM),
                # Lane-dense batch tile, default double-buffered pipeline
                # (compute >> DMA here, so no deeper buffering).
                pl.BlockSpec((block_rows, LANE), lambda i: (i, 0)),
            ],
            out_specs=pl.BlockSpec((block_rows, LANE), lambda i: (i, 0)),
        ),
        compiler_params=pltpu.CompilerParams(
            dimension_semantics=("parallel",),  # independent batch tiles (2 TCs on v7x)
        ),
    )(params, x2d)

    return out2d.reshape(-1)[:n].reshape(n, OUT_SIZE).astype(x.dtype)


def init_params(key):
    """Deterministic init mimicking PyTorch nn.Linear default U[-1/sqrt(fan_in), 1/sqrt(fan_in)]."""
    k1, k2, k3, k4 = jax.random.split(key, 4)
    bound1 = 1.0 / jnp.sqrt(jnp.float32(INPUT_SIZE))
    bound2 = 1.0 / jnp.sqrt(jnp.float32(HIDDEN_SIZE))
    # Stored as (in_features, out_features): transposed from torch's (out, in).
    w1 = jax.random.uniform(k1, (INPUT_SIZE, HIDDEN_SIZE), jnp.float32, -bound1, bound1)
    b1 = jax.random.uniform(k2, (1, HIDDEN_SIZE), jnp.float32, -bound1, bound1)
    w2 = jax.random.uniform(k3, (HIDDEN_SIZE, OUT_SIZE), jnp.float32, -bound2, bound2)
    b2 = jax.random.uniform(k4, (1, OUT_SIZE), jnp.float32, -bound2, bound2)
    return w1, b1, w2, b2


def reference_forward(x, w1, b1, w2, b2):
    h = jnp.tanh(x @ w1 + b1)
    return jnp.tanh(h @ w2 + b2)


if __name__ == "__main__":
    key = jax.random.PRNGKey(0)
    kx, kp = jax.random.split(key)
    w1, b1, w2, b2 = init_params(kp)

    # batch = 1024 -> exactly one (8, 128) lane-dense tile, zero padding.
    batch = 1024
    x = jax.random.uniform(kx, (batch, INPUT_SIZE), jnp.float32, -jnp.pi, jnp.pi)
    out = jax.block_until_ready(simple_nnet_forward(x, w1, b1, w2, b2))
    ref = reference_forward(x, w1, b1, w2, b2)
    assert out.shape == (batch, OUT_SIZE)
    assert jnp.allclose(out, ref, atol=1e-5, rtol=1e-5), "mismatch vs JAX reference"

    # Ragged batch exercises the padding / slicing path.
    batch2 = 37
    x2 = jax.random.uniform(kx, (batch2, INPUT_SIZE), jnp.float32, -jnp.pi, jnp.pi)
    out2 = jax.block_until_ready(simple_nnet_forward(x2, w1, b1, w2, b2))
    ref2 = reference_forward(x2, w1, b1, w2, b2)
    assert out2.shape == (batch2, OUT_SIZE)
    assert jnp.allclose(out2, ref2, atol=1e-5, rtol=1e-5), "mismatch vs JAX reference (ragged)"

    # bf16 tanh fast path: only on chips with native bf16 VPU/EUP (v6e / v7x).
    # Relaxed tolerance per the perf review's correctness note.
    kind = jax.devices()[0].device_kind.lower()
    if not any(old in kind for old in ("v2", "v3", "v4", "v5")):
        out_bf = jax.block_until_ready(
            simple_nnet_forward(x, w1, b1, w2, b2, tanh_dtype=jnp.bfloat16))
        assert out_bf.shape == (batch, OUT_SIZE)
        assert jnp.allclose(out_bf, ref, atol=2e-2, rtol=2e-2), "mismatch (bf16 fast path)"

    # TODO(synk): model_train / model_test (Adam optimizer loop, MSE loss) are host-side
    # training utilities, not part of the forward hot path, and are not kernelized here.

    print("KERNEL_OK")
</pallas_src>

<mosaic_0001>
module attributes {stable_mosaic.version = 11 : i64} {
  func.func @mlp_kernel(%arg0: i32, %arg1: memref<46xf32, #tpu.memory_space<smem>>, %arg2: memref<8x128xf32, #tpu.memory_space<vmem>>, %arg3: memref<8x128xf32, #tpu.memory_space<vmem>>) attributes {dimension_semantics = [#tpu.dimension_semantics<parallel>], iteration_bounds = array<i64: 1>, scalar_prefetch = 0 : i64, scratch_operands = 0 : i64, tpu.core_type = #tpu.core_type<tc>, window_params = [{transform_indices = @transform_0, window_bounds = array<i64: 46>}, {transform_indices = @transform_1, window_bounds = array<i64: 8, 128>}, {transform_indices = @transform_2, window_bounds = array<i64: 8, 128>}]} {
    %c0 = arith.constant 0 : index
    %0 = memref.load %arg1[%c0] : memref<46xf32, #tpu.memory_space<smem>>
    %c1 = arith.constant 1 : index
    %1 = memref.load %arg1[%c1] : memref<46xf32, #tpu.memory_space<smem>>
    %c2 = arith.constant 2 : index
    %2 = memref.load %arg1[%c2] : memref<46xf32, #tpu.memory_space<smem>>
    %c3 = arith.constant 3 : index
    %3 = memref.load %arg1[%c3] : memref<46xf32, #tpu.memory_space<smem>>
    %c4 = arith.constant 4 : index
    %4 = memref.load %arg1[%c4] : memref<46xf32, #tpu.memory_space<smem>>
    %c5 = arith.constant 5 : index
    %5 = memref.load %arg1[%c5] : memref<46xf32, #tpu.memory_space<smem>>
    %c6 = arith.constant 6 : index
    %6 = memref.load %arg1[%c6] : memref<46xf32, #tpu.memory_space<smem>>
    %c7 = arith.constant 7 : index
    %7 = memref.load %arg1[%c7] : memref<46xf32, #tpu.memory_space<smem>>
    %c8 = arith.constant 8 : index
    %8 = memref.load %arg1[%c8] : memref<46xf32, #tpu.memory_space<smem>>
    %c9 = arith.constant 9 : index
    %9 = memref.load %arg1[%c9] : memref<46xf32, #tpu.memory_space<smem>>
    %c10 = arith.constant 10 : index
    %10 = memref.load %arg1[%c10] : memref<46xf32, #tpu.memory_space<smem>>
    %c11 = arith.constant 11 : index
    %11 = memref.load %arg1[%c11] : memref<46xf32, #tpu.memory_space<smem>>
    %c12 = arith.constant 12 : index
    %12 = memref.load %arg1[%c12] : memref<46xf32, #tpu.memory_space<smem>>
    %c13 = arith.constant 13 : index
    %13 = memref.load %arg1[%c13] : memref<46xf32, #tpu.memory_space<smem>>
    %c14 = arith.constant 14 : index
    %14 = memref.load %arg1[%c14] : memref<46xf32, #tpu.memory_space<smem>>
    %c15 = arith.constant 15 : index
    %15 = memref.load %arg1[%c15] : memref<46xf32, #tpu.memory_space<smem>>
    %c16 = arith.constant 16 : index
    %16 = memref.load %arg1[%c16] : memref<46xf32, #tpu.memory_space<smem>>
    %c17 = arith.constant 17 : index
    %17 = memref.load %arg1[%c17] : memref<46xf32, #tpu.memory_space<smem>>
    %c18 = arith.constant 18 : index
    %18 = memref.load %arg1[%c18] : memref<46xf32, #tpu.memory_space<smem>>
    %c19 = arith.constant 19 : index
    %19 = memref.load %arg1[%c19] : memref<46xf32, #tpu.memory_space<smem>>
    %c20 = arith.constant 20 : index
    %20 = memref.load %arg1[%c20] : memref<46xf32, #tpu.memory_space<smem>>
    %c21 = arith.constant 21 : index
    %21 = memref.load %arg1[%c21] : memref<46xf32, #tpu.memory_space<smem>>
    %c22 = arith.constant 22 : index
    %22 = memref.load %arg1[%c22] : memref<46xf32, #tpu.memory_space<smem>>
    %c23 = arith.constant 23 : index
    %23 = memref.load %arg1[%c23] : memref<46xf32, #tpu.memory_space<smem>>
    %c24 = arith.constant 24 : index
    %24 = memref.load %arg1[%c24] : memref<46xf32, #tpu.memory_space<smem>>
    %c25 = arith.constant 25 : index
    %25 = memref.load %arg1[%c25] : memref<46xf32, #tpu.memory_space<smem>>
    %c26 = arith.constant 26 : index
    %26 = memref.load %arg1[%c26] : memref<46xf32, #tpu.memory_space<smem>>
    %c27 = arith.constant 27 : index
    %27 = memref.load %arg1[%c27] : memref<46xf32, #tpu.memory_space<smem>>
    %c28 = arith.constant 28 : index
    %28 = memref.load %arg1[%c28] : memref<46xf32, #tpu.memory_space<smem>>
    %c29 = arith.constant 29 : index
    %29 = memref.load %arg1[%c29] : memref<46xf32, #tpu.memory_space<smem>>
    %c30 = arith.constant 30 : index
    %30 = memref.load %arg1[%c30] : memref<46xf32, #tpu.memory_space<smem>>
    %c31 = arith.constant 31 : index
    %31 = memref.load %arg1[%c31] : memref<46xf32, #tpu.memory_space<smem>>
    %c32 = arith.constant 32 : index
    %32 = memref.load %arg1[%c32] : memref<46xf32, #tpu.memory_space<smem>>
    %c33 = arith.constant 33 : index
    %33 = memref.load %arg1[%c33] : memref<46xf32, #tpu.memory_space<smem>>
    %c34 = arith.constant 34 : index
    %34 = memref.load %arg1[%c34] : memref<46xf32, #tpu.memory_space<smem>>
    %c35 = arith.constant 35 : index
    %35 = memref.load %arg1[%c35] : memref<46xf32, #tpu.memory_space<smem>>
    %c36 = arith.constant 36 : index
    %36 = memref.load %arg1[%c36] : memref<46xf32, #tpu.memory_space<smem>>
    %c37 = arith.constant 37 : index
    %37 = memref.load %arg1[%c37] : memref<46xf32, #tpu.memory_space<smem>>
    %c38 = arith.constant 38 : index
    %38 = memref.load %arg1[%c38] : memref<46xf32, #tpu.memory_space<smem>>
    %c39 = arith.constant 39 : index
    %39 = memref.load %arg1[%c39] : memref<46xf32, #tpu.memory_space<smem>>
    %c40 = arith.constant 40 : index
    %40 = memref.load %arg1[%c40] : memref<46xf32, #tpu.memory_space<smem>>
    %c41 = arith.constant 41 : index
    %41 = memref.load %arg1[%c41] : memref<46xf32, #tpu.memory_space<smem>>
    %c42 = arith.constant 42 : index
    %42 = memref.load %arg1[%c42] : memref<46xf32, #tpu.memory_space<smem>>
    %c43 = arith.constant 43 : index
    %43 = memref.load %arg1[%c43] : memref<46xf32, #tpu.memory_space<smem>>
    %c44 = arith.constant 44 : index
    %44 = memref.load %arg1[%c44] : memref<46xf32, #tpu.memory_space<smem>>
    %c45 = arith.constant 45 : index
    %45 = memref.load %arg1[%c45] : memref<46xf32, #tpu.memory_space<smem>>
    %c0_0 = arith.constant 0 : index
    %c0_1 = arith.constant 0 : index
    %46 = vector.load %arg2[%c0_0, %c0_1] : memref<8x128xf32, #tpu.memory_space<vmem>>, vector<8x128xf32>
    %cst = arith.constant 0.000000e+00 : f32
    %47 = vector.broadcast %cst : f32 to vector<8x128xf32>
    %48 = vector.broadcast %0 : f32 to vector<8x128xf32>
    %49 = arith.mulf %46, %48 : vector<8x128xf32>
    %50 = vector.broadcast %15 : f32 to vector<8x128xf32>
    %51 = arith.addf %49, %50 : vector<8x128xf32>
    %52 = math.tanh %51 : vector<8x128xf32>
    %53 = vector.broadcast %30 : f32 to vector<8x128xf32>
    %54 = arith.mulf %52, %53 : vector<8x128xf32>
    %55 = arith.addf %47, %54 : vector<8x128xf32>
    %56 = vector.broadcast %1 : f32 to vector<8x128xf32>
    %57 = arith.mulf %46, %56 : vector<8x128xf32>
    %58 = vector.broadcast %16 : f32 to vector<8x128xf32>
    %59 = arith.addf %57, %58 : vector<8x128xf32>
    %60 = math.tanh %59 : vector<8x128xf32>
    %61 = vector.broadcast %31 : f32 to vector<8x128xf32>
    %62 = arith.mulf %60, %61 : vector<8x128xf32>
    %63 = arith.addf %55, %62 : vector<8x128xf32>
    %64 = vector.broadcast %2 : f32 to vector<8x128xf32>
    %65 = arith.mulf %46, %64 : vector<8x128xf32>
    %66 = vector.broadcast %17 : f32 to vector<8x128xf32>
    %67 = arith.addf %65, %66 : vector<8x128xf32>
    %68 = math.tanh %67 : vector<8x128xf32>
    %69 = vector.broadcast %32 : f32 to vector<8x128xf32>
    %70 = arith.mulf %68, %69 : vector<8x128xf32>
    %71 = arith.addf %63, %70 : vector<8x128xf32>
    %72 = vector.broadcast %3 : f32 to vector<8x128xf32>
    %73 = arith.mulf %46, %72 : vector<8x128xf32>
    %74 = vector.broadcast %18 : f32 to vector<8x128xf32>
    %75 = arith.addf %73, %74 : vector<8x128xf32>
    %76 = math.tanh %75 : vector<8x128xf32>
    %77 = vector.broadcast %33 : f32 to vector<8x128xf32>
    %78 = arith.mulf %76, %77 : vector<8x128xf32>
    %79 = arith.addf %71, %78 : vector<8x128xf32>
    %80 = vector.broadcast %4 : f32 to vector<8x128xf32>
    %81 = arith.mulf %46, %80 : vector<8x128xf32>
    %82 = vector.broadcast %19 : f32 to vector<8x128xf32>
    %83 = arith.addf %81, %82 : vector<8x128xf32>
    %84 = math.tanh %83 : vector<8x128xf32>
    %85 = vector.broadcast %34 : f32 to vector<8x128xf32>
    %86 = arith.mulf %84, %85 : vector<8x128xf32>
    %87 = arith.addf %79, %86 : vector<8x128xf32>
    %88 = vector.broadcast %5 : f32 to vector<8x128xf32>
    %89 = arith.mulf %46, %88 : vector<8x128xf32>
    %90 = vector.broadcast %20 : f32 to vector<8x128xf32>
    %91 = arith.addf %89, %90 : vector<8x128xf32>
    %92 = math.tanh %91 : vector<8x128xf32>
    %93 = vector.broadcast %35 : f32 to vector<8x128xf32>
    %94 = arith.mulf %92, %93 : vector<8x128xf32>
    %95 = arith.addf %87, %94 : vector<8x128xf32>
    %96 = vector.broadcast %6 : f32 to vector<8x128xf32>
    %97 = arith.mulf %46, %96 : vector<8x128xf32>
    %98 = vector.broadcast %21 : f32 to vector<8x128xf32>
    %99 = arith.addf %97, %98 : vector<8x128xf32>
    %100 = math.tanh %99 : vector<8x128xf32>
    %101 = vector.broadcast %36 : f32 to vector<8x128xf32>
    %102 = arith.mulf %100, %101 : vector<8x128xf32>
    %103 = arith.addf %95, %102 : vector<8x128xf32>
    %104 = vector.broadcast %7 : f32 to vector<8x128xf32>
    %105 = arith.mulf %46, %104 : vector<8x128xf32>
    %106 = vector.broadcast %22 : f32 to vector<8x128xf32>
    %107 = arith.addf %105, %106 : vector<8x128xf32>
    %108 = math.tanh %107 : vector<8x128xf32>
    %109 = vector.broadcast %37 : f32 to vector<8x128xf32>
    %110 = arith.mulf %108, %109 : vector<8x128xf32>
    %111 = arith.addf %103, %110 : vector<8x128xf32>
    %112 = vector.broadcast %8 : f32 to vector<8x128xf32>
    %113 = arith.mulf %46, %112 : vector<8x128xf32>
    %114 = vector.broadcast %23 : f32 to vector<8x128xf32>
    %115 = arith.addf %113, %114 : vector<8x128xf32>
    %116 = math.tanh %115 : vector<8x128xf32>
    %117 = vector.broadcast %38 : f32 to vector<8x128xf32>
    %118 = arith.mulf %116, %117 : vector<8x128xf32>
    %119 = arith.addf %111, %118 : vector<8x128xf32>
    %120 = vector.broadcast %9 : f32 to vector<8x128xf32>
    %121 = arith.mulf %46, %120 : vector<8x128xf32>
    %122 = vector.broadcast %24 : f32 to vector<8x128xf32>
    %123 = arith.addf %121, %122 : vector<8x128xf32>
    %124 = math.tanh %123 : vector<8x128xf32>
    %125 = vector.broadcast %39 : f32 to vector<8x128xf32>
    %126 = arith.mulf %124, %125 : vector<8x128xf32>
    %127 = arith.addf %119, %126 : vector<8x128xf32>
    %128 = vector.broadcast %10 : f32 to vector<8x128xf32>
    %129 = arith.mulf %46, %128 : vector<8x128xf32>
    %130 = vector.broadcast %25 : f32 to vector<8x128xf32>
    %131 = arith.addf %129, %130 : vector<8x128xf32>
    %132 = math.tanh %131 : vector<8x128xf32>
    %133 = vector.broadcast %40 : f32 to vector<8x128xf32>
    %134 = arith.mulf %132, %133 : vector<8x128xf32>
    %135 = arith.addf %127, %134 : vector<8x128xf32>
    %136 = vector.broadcast %11 : f32 to vector<8x128xf32>
    %137 = arith.mulf %46, %136 : vector<8x128xf32>
    %138 = vector.broadcast %26 : f32 to vector<8x128xf32>
    %139 = arith.addf %137, %138 : vector<8x128xf32>
    %140 = math.tanh %139 : vector<8x128xf32>
    %141 = vector.broadcast %41 : f32 to vector<8x128xf32>
    %142 = arith.mulf %140, %141 : vector<8x128xf32>
    %143 = arith.addf %135, %142 : vector<8x128xf32>
    %144 = vector.broadcast %12 : f32 to vector<8x128xf32>
    %145 = arith.mulf %46, %144 : vector<8x128xf32>
    %146 = vector.broadcast %27 : f32 to vector<8x128xf32>
    %147 = arith.addf %145, %146 : vector<8x128xf32>
    %148 = math.tanh %147 : vector<8x128xf32>
    %149 = vector.broadcast %42 : f32 to vector<8x128xf32>
    %150 = arith.mulf %148, %149 : vector<8x128xf32>
    %151 = arith.addf %143, %150 : vector<8x128xf32>
    %152 = vector.broadcast %13 : f32 to vector<8x128xf32>
    %153 = arith.mulf %46, %152 : vector<8x128xf32>
    %154 = vector.broadcast %28 : f32 to vector<8x128xf32>
    %155 = arith.addf %153, %154 : vector<8x128xf32>
    %156 = math.tanh %155 : vector<8x128xf32>
    %157 = vector.broadcast %43 : f32 to vector<8x128xf32>
    %158 = arith.mulf %156, %157 : vector<8x128xf32>
    %159 = arith.addf %151, %158 : vector<8x128xf32>
    %160 = vector.broadcast %14 : f32 to vector<8x128xf32>
    %161 = arith.mulf %46, %160 : vector<8x128xf32>
    %162 = vector.broadcast %29 : f32 to vector<8x128xf32>
    %163 = arith.addf %161, %162 : vector<8x128xf32>
    %164 = math.tanh %163 : vector<8x128xf32>
    %165 = vector.broadcast %44 : f32 to vector<8x128xf32>
    %166 = arith.mulf %164, %165 : vector<8x128xf32>
    %167 = arith.addf %159, %166 : vector<8x128xf32>
    %168 = vector.broadcast %45 : f32 to vector<8x128xf32>
    %169 = arith.addf %167, %168 : vector<8x128xf32>
    %170 = math.tanh %169 : vector<8x128xf32>
    %c0_2 = arith.constant 0 : index
    %c0_3 = arith.constant 0 : index
    %171 = vector.load %arg3[%c0_2, %c0_3] : memref<8x128xf32, #tpu.memory_space<vmem>>, vector<8x128xf32>
    tpu.vector_store %arg3[%c0_2, %c0_3], %170 {strides = array<i32>} : memref<8x128xf32, #tpu.memory_space<vmem>>, vector<8x128xf32>,
    return
  }
  func.func @transform_0(%arg0: i32) -> i32 {
    %c0_i32 = arith.constant 0 : i32
    %c0_i32_0 = arith.constant 0 : i32
    return %c0_i32 : i32
  }
  func.func @transform_1(%arg0: i32) -> (i32, i32) {
    %c0_i32 = arith.constant 0 : i32
    %c0_i32_0 = arith.constant 0 : i32
    return %arg0, %c0_i32 : i32, i32
  }
  func.func @transform_2(%arg0: i32) -> (i32, i32) {
    %c0_i32 = arith.constant 0 : i32
    %c0_i32_0 = arith.constant 0 : i32
    return %arg0, %c0_i32 : i32, i32
  }
}

</mosaic_0001>

<bundles_post_ra>
// kernel: tpu_custom_call.1
= control target key start
LH: loop header
LB: loop body
LE: loop exit
PB: predicated region body
PF: predicated region fallthrough
CT: control target
= control target key end

     0   :  { %7 = vsyncpa [#allocation5], 0  ;;  %s535_s0 = inlined_call_operand.hbm [shape: f32[46], index: 0, kind: input, shape index: {}]   ;;  %s536_s1 = inlined_call_operand.hbm [shape: f32[8,128], index: 1, kind: input, shape index: {}]   ;;  %s537_s2 = inlined_call_operand.hbm [shape: f32[8,128], index: 2, kind: output, shape index: {}]  }
   0x1   :  { %8 = vsyncpa [#allocation3], 0 }
   0x2   :  { %9 = vsyncpa [#allocation4], 0  ;;  %s302_s11 = scalar_lea.hbm %s535_s0, 16 }
   0x3   :  { %p303_p0 = scmp.ne.s32.totalorder %s535_s0, %s302_s11  ;;  %p306_p1 = scmp.lt.u32.totalorder %s302_s11, %s535_s0 }
   0x5   :  { %p308_p2 = pnand %p306_p1, %p303_p0 }
   0x7   :  { %311 = shalt.err (!%p308_p2)
}
   0x8   :  { %s362_s16 = smov [#allocation2]   ;;  %s363_s19 = smov [#allocation6]  }
   0x9   :  { %17 = dma.hbm_to_smem %s535_s0, 16, %s362_s16, [#allocation5]  }
   0xa   :  { %s24_s20 = sshll.u32 %s363_s19, 4  ;;  %s312_s23 = scalar_lea.hbm %s536_s1, 128  ;;  %s25_s20 = int_to_ptr.vmem [resolvable:$true] %s24_s20 }
   0xb   :  { %p313_p3 = scmp.ne.s32.totalorder %s536_s1, %s312_s23  ;;  %p316_p4 = scmp.lt.u32.totalorder %s312_s23, %s536_s1 }
   0xd   :  { %p318_p5 = pnand %p316_p4, %p313_p3 }
   0xf   :  { %321 = shalt.err (!%p318_p5)
}
  0x10   :  { %s322_s28 = scalar_lea.vmem %s25_s20, 128  ;;  %p327_p7 = scmp.lt.s32.totalorder %s25_s20, %s25_s20 }
  0x11   :  { %p323_p6 = scmp.ne.s32.totalorder %s25_s20, %s322_s28  ;;  %p328_p8 = scmp.lt.s32.totalorder %s322_s28, %s322_s28 }
  0x13   :  { %p329_p9 = por %p328_p8, %p327_p7 }
  0x15   :  { %p330_p10 = pnand %p329_p9, %p323_p6 }
  0x17   :  { %333 = shalt.err (!%p330_p10)
}
  0x18   :  { %27 = dma.hbm_to_vmem [thread:$0]  %s536_s1, 128, %s25_s20, [#allocation3]  }
  0x19   :  { %356 = dma.done.wait [#allocation5], 16  }
  0x1a   :  { %357 = vsyncadd [#allocation5], 4294967280 }
  0x1b   :  { %358 = dma.done.wait [#allocation3], 128  }
  0x1c   :  { %359 = vsyncadd [#allocation3], 4294967168 }
  0x1d   :  { %34 = sfence }
  0x1e   :  { %s35_s30 = sld [smem:[#allocation2]]  ;;  %s222_s3 = sld [smem:[#allocation2 + $0x1]]  ;;  %v412_v0 = vld [vmem:[#allocation6] sm:$0xff] }
  0x1f   :  { %s223_s4 = sld [smem:[#allocation2 + $0x2]]  ;;  %s224_s5 = sld [smem:[#allocation2 + $0x3]] }
  0x20   :  { %s225_s6 = sld [smem:[#allocation2 + $0x4]]  ;;  %s404_s7 = sld [smem:[#allocation2 + $0x5]] }
  0x21   :  { %s227_s8 = sld [smem:[#allocation2 + $0x6]]  ;;  %s406_s9 = sld [smem:[#allocation2 + $0x7]] }
  0x22   :  { %s408_s10 = sld [smem:[#allocation2 + $0x8]]  ;;  %s410_s11 = sld [smem:[#allocation2 + $0x9]] }
  0x23   :  { %s236_s1 = sld [smem:[#allocation2 + $0xf]]  ;;  %s414_s12 = sld [smem:[#allocation2 + $0x10]] }
  0x24   :  { %v82_v1 = vstv %s35_s30  ;;  %s416_s13 = sld [smem:[#allocation2 + $0x11]]  ;;  %v90_v2 = vstv %s222_s3  ;;  %s418_s14 = sld [smem:[#allocation2 + $0x12]] }
  0x25   :  { %v98_v3 = vstv %s223_s4  ;;  %s420_s15 = sld [smem:[#allocation2 + $0x13]]  ;;  %v106_v4 = vstv %s224_s5  ;;  %s422_s16 = sld [smem:[#allocation2 + $0x14]]  ;;  %v83_v6 = vmul.f32 %v82_v1, %v412_v0  ;;  %v91_v9 = vmul.f32 %v90_v2, %v412_v0 }
  0x26   :  { %v114_v5 = vstv %s225_s6  ;;  %s424_s17 = sld [smem:[#allocation2 + $0x15]]  ;;  %v122_v7 = vstv %s404_s7  ;;  %s428_s18 = sld [smem:[#allocation2 + $0x16]]  ;;  %v99_v10 = vmul.f32 %v98_v3, %v412_v0  ;;  %v107_v11 = vmul.f32 %v106_v4, %v412_v0 }
  0x27   :  { %v130_v8 = vstv %s227_s8  ;;  %s432_s19 = sld [smem:[#allocation2 + $0xa]]  ;;  %s434_s20 = sld [smem:[#allocation2 + $0x17]]  ;;  %v115_v12 = vmul.f32 %v114_v5, %v412_v0  ;;  %v123_v14 = vmul.f32 %v122_v7, %v412_v0  ;;  %v138_v16 = vstv %s406_s9 }
  0x28   :  { %s438_s21 = sld [smem:[#allocation2 + $0xb]]  ;;  %v131_v15 = vmul.f32 %v130_v8, %v412_v0  ;;  %s443_s22 = sld [smem:[#allocation2 + $0x18]]  ;;  %v146_v20 = vstv %s408_s10  ;;  %v139_v30 = vmul.f32 %v138_v16, %v412_v0  ;;  %v154_v32 = vstv %s410_s11 }
  0x29   :  { %v84_v13 = vstv %s236_s1  ;;  %v92_v18 = vstv %s414_s12  ;;  %s448_s23 = sld [smem:[#allocation2 + $0xc]]  ;;  %s452_s24 = sld [smem:[#allocation2 + $0x19]]  ;;  %v147_v34 = vmul.f32 %v146_v20, %v412_v0  ;;  %v155_v38 = vmul.f32 %v154_v32, %v412_v0 }
  0x2a   :  { %v85_v17 = vadd.f32 %v84_v13, %v83_v6  ;;  %v100_v19 = vstv %s416_s13  ;;  %v93_v21 = vadd.f32 %v92_v18, %v91_v9  ;;  %v108_v23 = vstv %s418_s14  ;;  %s454_s25 = sld [smem:[#allocation2 + $0x1e]]  ;;  %s457_s26 = sld [smem:[#allocation2 + $0xd]] }
  0x2b   :  { %v101_v22 = vadd.f32 %v100_v19, %v99_v10  ;;  %v116_v24 = vstv %s420_s15  ;;  %v109_v25 = vadd.f32 %v108_v23, %v107_v11  ;;  %v124_v27 = vstv %s422_s16  ;;  %s459_s27 = sld [smem:[#allocation2 + $0x1f]]  ;;  %s463_s28 = sld [smem:[#allocation2 + $0x1a]] }
  0x2c   :  { %270 = vtanh.f32 %v85_v17  ;;  %v117_v26 = vadd.f32 %v116_v24, %v115_v12  ;;  %v125_v28 = vadd.f32 %v124_v27, %v123_v14  ;;  %v132_v29 = vstv %s424_s17  ;;  %s465_s0 = sld [smem:[#allocation2 + $0x20]]  ;;  %s469_s29 = sld [smem:[#allocation2 + $0x21]] }
  0x2d   :  { %272 = vtanh.f32 %v93_v21  ;;  %v140_v31 = vstv %s428_s18  ;;  %v133_v33 = vadd.f32 %v132_v29, %v131_v15  ;;  %s472_s30 = sld [smem:[#allocation2 + $0xe]]  ;;  %s474_s3 = sld [smem:[#allocation2 + $0x1b]]  ;;  %v148_v35 = vstv %s434_s20 }
  0x2e   :  { %274 = vtanh.f32 %v101_v22  ;;  %v162_v36 = vstv %s432_s19  ;;  %s478_s4 = sld [smem:[#allocation2 + $0x22]]  ;;  %v141_v37 = vadd.f32 %v140_v31, %v139_v30  ;;  %v170_v39 = vstv %s438_s21  ;;  %s482_s5 = sld [smem:[#allocation2 + $0x1c]] }
  0x2f   :  { %276 = vtanh.f32 %v109_v25  ;;  %v156_v40 = vstv %s443_s22  ;;  %s485_s6 = sld [smem:[#allocation2 + $0x23]]  ;;  %v149_v41 = vadd.f32 %v148_v35, %v147_v34  ;;  %v163_v42 = vmul.f32 %v162_v36, %v412_v0  ;;  %s489_s7 = sld [smem:[#allocation2 + $0x1d]] }
  0x30   :  { %278 = vtanh.f32 %v117_v26  ;;  %v178_v43 = vstv %s448_s23  ;;  %v87_v44 = vstv %s454_s25  ;;  %v164_v45 = vstv %s452_s24  ;;  %s494_s8 = sld [smem:[#allocation2 + $0x24]]  ;;  %s501_s9 = sld [smem:[#allocation2 + $0x25]] }
  0x31   :  { %280 = vtanh.f32 %v125_v28  ;;  %v171_v46 = vmul.f32 %v170_v39, %v412_v0  ;;  %v95_v47 = vstv %s459_s27  ;;  %v157_v48 = vadd.f32 %v156_v40, %v155_v38  ;;  %s507_s10 = sld [smem:[#allocation2 + $0x26]]  ;;  %s511_s11 = sld [smem:[#allocation2 + $0x27]] }
  0x32   :  { %282 = vtanh.f32 %v133_v33  ;;  %v186_v49 = vstv %s457_s26  ;;  %v103_v51 = vstv %s465_s0  ;;  %v172_v52 = vstv %s463_s28  ;;  %s516_s1 = sld [smem:[#allocation2 + $0x28]]  ;;  %s262_s12 = sld [smem:[#allocation2 + $0x29]] }
  0x33   :  { %284 = vtanh.f32 %v141_v37  ;;  %v179_v53 = vmul.f32 %v178_v43, %v412_v0  ;;  %v111_v56 = vstv %s469_s29  ;;  %v165_v57 = vadd.f32 %v164_v45, %v163_v42  ;;  %s263_s13 = sld [smem:[#allocation2 + $0x2a]]  ;;  %s264_s14 = sld [smem:[#allocation2 + $0x2b]] }
  0x34   :  { %286 = vtanh.f32 %v149_v41  ;;  %v180_v60 = vstv %s474_s3  ;;  %v187_v61 = vmul.f32 %v186_v49, %v412_v0  ;;  %v194_v62 = vstv %s472_s30  ;;  %s265_s15 = sld [smem:[#allocation2 + $0x2c]]  ;;  %s266_s16 = sld [smem:[#allocation2 + $0x2d]] }
  0x35   :  { %v119_v2 = vstv %s478_s4  ;;  %288 = vtanh.f32 %v157_v48  ;;  %v173_v3 = vadd.f32 %v172_v52, %v171_v46  ;;  %v188_v7 = vstv %s482_s5  ;;  %s364_s17 = smov [#allocation7]  }
  0x36   :  { %v271_v50 = vpop.eup %270  ;;  %v127_v9 = vstv %s485_s6  ;;  %290 = vtanh.f32 %v165_v57  ;;  %v181_v10 = vadd.f32 %v180_v60, %v179_v53  ;;  %v195_v11 = vmul.f32 %v194_v62, %v412_v0  ;;  %s212_s18 = sshll.u32 %s364_s17, 4  ;;  %s213_s18 = int_to_ptr.vmem [resolvable:$true] %s212_s18 }
  0x37   :  { %v273_v54 = vpop.eup %272  ;;  %v88_v55 = vmul.f32 %v271_v50, %v87_v44  ;;  %v196_v14 = vstv %s489_s7  ;;  %v135_v16 = vstv %s494_s8  ;;  %292 = vtanh.f32 %v173_v3  ;;  %s334_s19 = scalar_lea.vmem %s213_s18, 128  ;;  %p339_p12 = scmp.lt.s32.totalorder %s213_s18, %s213_s18 }
  0x38   :  { %v275_v58 = vpop.eup %274  ;;  %v96_v59 = vmul.f32 %v273_v54, %v95_v47  ;;  %v189_v17 = vadd.f32 %v188_v7, %v187_v61  ;;  %v143_v21 = vstv %s501_s9  ;;  %294 = vtanh.f32 %v181_v10  ;;  %p335_p11 = scmp.ne.s32.totalorder %s213_s18, %s334_s19  ;;  %p340_p13 = scmp.lt.s32.totalorder %s334_s19, %s334_s19 }
  0x39   :  { %v277_v63 = vpop.eup %276  ;;  %v104_v1 = vmul.f32 %v275_v58, %v103_v51  ;;  %v197_v22 = vadd.f32 %v196_v14, %v195_v11  ;;  %v151_v25 = vstv %s507_s10  ;;  %v159_v29 = vstv %s511_s11 }
  0x3a   :  { %v279_v4 = vpop.eup %278  ;;  %v97_v5 = vadd.f32 %v96_v59, %v88_v55  ;;  %v112_v6 = vmul.f32 %v277_v63, %v111_v56  ;;  %296 = vtanh.f32 %v189_v17  ;;  %v167_v33 = vstv %s516_s1  ;;  %p341_p0 = por %p340_p13, %p339_p12 }
  0x3b   :  { %v281_v8 = vpop.eup %280  ;;  %v120_v13 = vmul.f32 %v279_v4, %v119_v2  ;;  %298 = vtanh.f32 %v197_v22  ;;  %v175_v37 = vstv %s262_s12  ;;  %v183_v41 = vstv %s263_s13 }
  0x3c   :  { %v105_v12 = vadd.f32 %v104_v1, %v97_v5  ;;  %v283_v15 = vpop.eup %282  ;;  %v128_v19 = vmul.f32 %v281_v8, %v127_v9  ;;  %v191_v45 = vstv %s264_s14  ;;  %v199_v49 = vstv %s265_s15  ;;  %p342_p1 = pnand %p341_p0, %p335_p11 }
  0x3d   :  { %v285_v20 = vpop.eup %284  ;;  %v136_v0 = vmul.f32 %v283_v15, %v135_v16  ;;  %v202_v55 = vstv %s266_s16 }
  0x3e   :  { %v113_v18 = vadd.f32 %v112_v6, %v105_v12  ;;  %v287_v24 = vpop.eup %286  ;;  %v144_v27 = vmul.f32 %v285_v20, %v143_v21 }
  0x3f   :  { %v289_v28 = vpop.eup %288  ;;  %v152_v31 = vmul.f32 %v287_v24, %v151_v25 }
  0x40   :  { %v121_v23 = vadd.f32 %v120_v13, %v113_v18  ;;  %v291_v32 = vpop.eup %290  ;;  %v160_v35 = vmul.f32 %v289_v28, %v159_v29 }
  0x41   :  { %v293_v36 = vpop.eup %292  ;;  %v168_v39 = vmul.f32 %v291_v32, %v167_v33 }
  0x42   :  { %v129_v26 = vadd.f32 %v128_v19, %v121_v23  ;;  %v295_v40 = vpop.eup %294  ;;  %v176_v43 = vmul.f32 %v293_v36, %v175_v37 }
  0x43   :  { %v184_v47 = vmul.f32 %v295_v40, %v183_v41 }
  0x44   :  { %v137_v30 = vadd.f32 %v136_v0, %v129_v26  ;;  %v297_v44 = vpop.eup %296 }
  0x45   :  { %v299_v48 = vpop.eup %298  ;;  %v192_v51 = vmul.f32 %v297_v44, %v191_v45 }
  0x46   :  { %v145_v34 = vadd.f32 %v144_v27, %v137_v30  ;;  %v200_v53 = vmul.f32 %v299_v48, %v199_v49 }
  0x48   :  { %v153_v38 = vadd.f32 %v152_v31, %v145_v34 }
  0x4a   :  { %v161_v42 = vadd.f32 %v160_v35, %v153_v38 }
  0x4c   :  { %v169_v46 = vadd.f32 %v168_v39, %v161_v42 }
  0x4e   :  { %v177_v50 = vadd.f32 %v176_v43, %v169_v46 }
  0x50   :  { %v185_v52 = vadd.f32 %v184_v47, %v177_v50 }
  0x52   :  { %v193_v54 = vadd.f32 %v192_v51, %v185_v52 }
  0x54   :  { %v201_v56 = vadd.f32 %v200_v53, %v193_v54 }
  0x56   :  { %v203_v57 = vadd.f32 %v202_v55, %v201_v56 }
  0x58   :  { %300 = vtanh.f32 %v203_v57 }
  0x62   :  { %v301_v58 = vpop.eup %300 }
  0x63   :  { %205 = vst [vmem:[#allocation7] sm:$0xff] %v301_v58 }
  0x64   :  { %345 = shalt.err (!%p342_p1)
}
  0x65   :  { %s346_s22 = scalar_lea.hbm %s537_s2, 128 }
  0x66   :  { %p347_p2 = scmp.ne.s32.totalorder %s537_s2, %s346_s22  ;;  %p350_p3 = scmp.lt.u32.totalorder %s346_s22, %s537_s2 }
  0x68   :  { %p352_p4 = pnand %p350_p3, %p347_p2 }
  0x6a   :  { %355 = shalt.err (!%p352_p4)
}
  0x6b   :  { %215 = dma.vmem_to_hbm [thread:$0]  %s213_s18, 128, %s537_s2, [#allocation4]  }
  0x6c   :  { %360 = dma.done.wait [#allocation4], 128  }
  0x6d   :  { %361 = vsyncadd [#allocation4], 4294967168 }
  0x6e   :  { %219 = vsyncpa [#allocation3], 1 }
  0x6f   :  { %220 = vsyncpa [#allocation4], 1 }
  0x70   :  { %221 = vsyncpa [#allocation5], 1 }

</bundles_post_ra>
